<compile_context>
chip_gen: v7x
topology: tpu7x:2x2x1
jax: 0.10.0
libtpu: 0.0.40
codegen_flags: <defaults>
</compile_context>

<pallas_src>
import math

import jax
import jax.numpy as jnp
from jax.experimental import pallas as pl
from jax.experimental.pallas import tpu as pltpu


def _lane_roll(x, k):
  """out[..., i] = x[..., (i + k) % n]: static lane rotation via two slices + concat."""
  n = x.shape[-1]
  k = k % n
  if k == 0:
    return x
  return jnp.concatenate([x[..., k:], x[..., :k]], axis=-1)


def _make_pwsa_kernel(batch, embed_dim):
  """Fused (embed+QKV) -> cross-batch attention -> (out-proj+un-embed), images lane-packed."""

  def kernel(xp_ref, wqkv_ref, bqkv_ref, sseg_ref, sexp_ref, wout_ref, bout_ref, o_ref):
    f32 = jnp.float32
    be = batch * embed_dim

    x = xp_ref[...]                                        # (G, B*D) lane-dense token tile
    # One MXU pass gives Q, K, V for every head and every image (patch-embed already folded in).
    qkv = jnp.dot(x, wqkv_ref[...], preferred_element_type=f32) + bqkv_ref[...]   # (G, 3*B*E)
    q = qkv[:, :be]                                        # (G, B*E)  [Q_img0 | Q_img1 | ...]
    k = qkv[:, be:2 * be]
    v = qkv[:, 2 * be:]

    # Attention across the image batch (the MHA "sequence" axis), independently per patch row and
    # head.  For shift s, roll(K, s*E) aligns key-image (b+s)%B with query-image b in the lanes, so
    # (Q * roll(K)) @ S_seg yields the logits of all (b, (b+s)%B) pairs for all heads, lane-packed.
    sseg = sseg_ref[...]                                   # (B*E, B*nh) block-diag head seg-sum
    sexp = sexp_ref[...]                                   # (B*nh, B*E) transpose (prob broadcast)
    logits = [jnp.dot(q * _lane_roll(k, s * embed_dim), sseg, preferred_element_type=f32)
              for s in range(batch)]                       # each (G, B*nh)

    m = logits[0]
    for s in range(1, batch):
      m = jnp.maximum(m, logits[s])
    exps = [jnp.exp(lg - m) for lg in logits]
    denom = exps[0]
    for s in range(1, batch):
      denom = denom + exps[s]
    inv = pl.reciprocal(denom, approx=True)                # EUP slot

    ctx = None                                             # (G, B*E) lane-packed per-image context
    for s in range(batch):
      probs = jnp.dot(exps[s] * inv, sexp, preferred_element_type=f32)     # (G, B*E)
      term = probs * _lane_roll(v, s * embed_dim)
      ctx = term if ctx is None else ctx + term

    # out-proj, attn_scale and the ConvTranspose (stride==kernel) are all folded into wout/bout.
    out = jnp.dot(ctx, wout_ref[...], preferred_element_type=f32) + bout_ref[...]  # (G, B*D)
    o_ref[...] = out.astype(o_ref.dtype)

  return kernel


def _tpu_topology():
  """Best-effort (VMEM capacity, #TensorCores sharing the grid); safe defaults if unknown."""
  vmem_bytes = 128 * 1024 * 1024
  num_cores = 1
  try:
    info = pltpu.get_tpu_info()
    vmem_bytes = int(getattr(info, "vmem_capacity_bytes", vmem_bytes))
    num_cores = max(num_cores, int(getattr(info, "num_cores", 1) or 1))
  except Exception:
    pass
  try:
    dev = jax.devices()[0]
    num_cores = max(num_cores, int(getattr(dev, "num_cores", 1) or 1))
    kind = str(getattr(dev, "device_kind", "")).lower()
    if ("v4" in kind) or ("v5p" in kind) or ("7" in kind):   # megacore / dual-TC generations
      num_cores = max(num_cores, 2)
  except Exception:
    pass
  return vmem_bytes, num_cores


def _pick_group_block(num_groups, bytes_per_group, *, vmem_bytes, num_cores):
  """Largest divisor of num_groups (multiple of 8, or the full extent) whose working set fits
  comfortably in VMEM.  Only on multi-TensorCore chips do we prefer >= num_cores grid steps so the
  'parallel' axis can actually be sharded; single-TC chips take the biggest block (fewer steps)."""
  budget = max(vmem_bytes // 3, 8 * bytes_per_group)
  cap = max(8, budget // max(1, bytes_per_group))
  cands = [g for g in range(1, num_groups + 1)
           if num_groups % g == 0 and (g % 8 == 0 or g == num_groups) and g <= cap]
  if not cands:
    return num_groups
  if num_cores > 1:
    split = [g for g in cands if num_groups // g >= num_cores]
    if split:
      return max(split)
  return max(cands)


def patchwise_self_attention_forward(x, params, *, patch_size, num_heads,
                                     group_block=None, vmem_limit_bytes=None):
  """x: (B, C, H, W) float32.  Returns (B, C, H, W)."""
  b, c, h, w = x.shape
  p = patch_size
  assert h % p == 0 and w % p == 0, "spatial dims must be divisible by patch_size"
  e = params["w_embed"].shape[0]
  assert e % num_heads == 0
  dh = e // num_heads
  hp, wp = h // p, w // p
  l = hp * wp
  d = c * p * p
  lane_w = b * d                                   # token-table width: image batch packed on lanes

  # ---- patchify: (B, C, H, W) -> (L, B*D); per-image feature order is (C, p, p) ----
  patches = (x.reshape(b, c, hp, p, wp, p)
             .transpose(2, 4, 0, 1, 3, 5)          # (hp, wp, B, C, p, p)
             .reshape(l, lane_w))

  # ---- host-side weight folding (all exact affine rewrites) ----
  f32 = jnp.float32
  we = params["w_embed"].reshape(e, d).T.astype(f32)        # (D, E)  Conv2d patch-embed as matmul
  be_row = params["b_embed"].astype(f32).reshape(1, e)
  w_in = params["in_proj_w"].astype(f32)                    # (3E, E) rows: q, k, v
  b_in = params["in_proj_b"].astype(f32)
  q_scale = 1.0 / math.sqrt(dh)                             # PyTorch scales q by head_dim**-0.5

  def fold_qkv(wm, bm, s):
    w_r = wm.T * s                                          # (E, E) right-multiplier
    return we @ w_r, (be_row @ w_r).reshape(-1) + bm * s    # (D, E), (E,)

  wq_f, bq_f = fold_qkv(w_in[:e], b_in[:e], q_scale)
  wk_f, bk_f = fold_qkv(w_in[e:2 * e], b_in[e:2 * e], 1.0)
  wv_f, bv_f = fold_qkv(w_in[2 * e:], b_in[2 * e:], 1.0)

  s_attn = params["attn_scale"].astype(f32).reshape(())
  wu = params["w_up"].astype(f32).reshape(e, d)             # (E, D)  ConvTranspose, stride==kernel
  bu = jnp.repeat(params["b_up"].astype(f32), p * p)        # (D,)    c-major (c, p, p) repeat
  w_cu = s_attn * (params["out_proj_w"].astype(f32).T @ wu)             # (E, D)
  b_cu = s_attn * (params["out_proj_b"].astype(f32) @ wu) + bu          # (D,)

  # Block-diagonal packing over the image batch: per-image maps stay separate while the matmuls and
  # loads/stores are lane-dense.  NOTE: block-diag weights scale O(B^2 * D * E); for a large image
  # batch, fall back to sublane-flattened per-image matmuls instead.
  eye_b = jnp.eye(b, dtype=f32)
  wqkv_bd = jnp.concatenate([jnp.kron(eye_b, wq_f), jnp.kron(eye_b, wk_f),
                             jnp.kron(eye_b, wv_f)], axis=1)            # (B*D, 3*B*E)
  bqkv = jnp.concatenate([jnp.tile(bq_f, b), jnp.tile(bk_f, b),
                          jnp.tile(bv_f, b)]).reshape(1, 3 * b * e)
  seg = (jnp.arange(e)[:, None] // dh == jnp.arange(num_heads)[None, :]).astype(f32)   # (E, nh)
  sseg_bd = jnp.kron(eye_b, seg)                                        # (B*E, B*nh)
  sexp_bd = jnp.kron(eye_b, seg.T)                                      # (B*nh, B*E)
  wout_bd = jnp.kron(eye_b, w_cu)                                       # (B*E, B*D)
  bout = jnp.tile(b_cu, b).reshape(1, lane_w)

  # ---- chip-aware grid / VMEM sizing ----
  vmem_cap, num_cores = _tpu_topology()
  if group_block is None:
    bytes_per_group = 4 * (5 * lane_w + 8 * b * e)          # I/O tiles (x2 buf) + temporaries, f32
    group_block = _pick_group_block(l, bytes_per_group, vmem_bytes=vmem_cap, num_cores=num_cores)
  assert l % group_block == 0
  weight_bytes = 4 * (wqkv_bd.size + bqkv.size + sseg_bd.size + sexp_bd.size
                      + wout_bd.size + bout.size)
  if vmem_limit_bytes is None:
    tile_bytes = 2 * 2 * group_block * lane_w * 4           # double-buffered in + out tiles, f32
    vmem_limit_bytes = min((vmem_cap * 3) // 4,
                           max(32 << 20, 2 * tile_bytes + 2 * weight_bytes + (8 << 20)))

  grid = (l // group_block,)
  full = lambda i: (0, 0)

  out_tok = pl.pallas_call(
      _make_pwsa_kernel(b, e),
      out_shape=jax.ShapeDtypeStruct((l, lane_w), x.dtype),
      grid_spec=pltpu.PrefetchScalarGridSpec(
          num_scalar_prefetch=0,
          grid=grid,
          in_specs=[
              pl.BlockSpec((group_block, lane_w), lambda i: (i, 0)),    # token tile (lane-dense)
              pl.BlockSpec((b * d, 3 * b * e), full),                   # folded embed+QKV (blk-diag)
              pl.BlockSpec((1, 3 * b * e), full),                       # folded QKV bias
              pl.BlockSpec((b * e, b * num_heads), full),               # head segment-sum matrix
              pl.BlockSpec((b * num_heads, b * e), full),               # its transpose
              pl.BlockSpec((b * e, lane_w), full),                      # folded out-proj+un-embed
              pl.BlockSpec((1, lane_w), full),                          # folded output bias
          ],
          out_specs=pl.BlockSpec((group_block, lane_w), lambda i: (i, 0)),
      ),
      compiler_params=pltpu.CompilerParams(
          dimension_semantics=("parallel",),
          vmem_limit_bytes=int(vmem_limit_bytes),
      ),
  )(patches, wqkv_bd, bqkv, sseg_bd, sexp_bd, wout_bd, bout)

  # ---- unpatchify: (L, B*D) -> (B, C, H, W) ----
  out = (out_tok.reshape(hp, wp, b, c, p, p)
         .transpose(2, 3, 0, 4, 1, 5)               # (B, C, hp, p, wp, p)
         .reshape(b, c, h, w))
  return out


def patchwise_self_attention_reference(x, params, *, patch_size, num_heads):
  """Pure-JAX reference mirroring the PyTorch forward exactly (batch_first=False semantics)."""
  hi = jax.lax.Precision.HIGHEST
  b, c, h, w = x.shape
  p = patch_size
  e = params["w_embed"].shape[0]
  dh = e // num_heads
  hp, wp = h // p, w // p
  l = hp * wp

  # Conv2d(C -> E, kernel=P, stride=P)
  z = jax.lax.conv_general_dilated(
      x.astype(jnp.float32), params["w_embed"].astype(jnp.float32),
      window_strides=(p, p), padding="VALID",
      dimension_numbers=("NCHW", "OIHW", "NCHW"), precision=hi)
  z = z + params["b_embed"].reshape(1, e, 1, 1)
  t = z.reshape(b, e, l).transpose(0, 2, 1)                        # (B, L, E)

  # nn.MultiheadAttention with batch_first=False reads (B, L, E) as (seq=B, batch=L, E).
  w_in, b_in = params["in_proj_w"], params["in_proj_b"]
  q = jnp.einsum("sle,fe->slf", t, w_in[:e], precision=hi) + b_in[:e]
  k = jnp.einsum("sle,fe->slf", t, w_in[e:2 * e], precision=hi) + b_in[e:2 * e]
  v = jnp.einsum("sle,fe->slf", t, w_in[2 * e:], precision=hi) + b_in[2 * e:]
  qh = q.reshape(b, l, num_heads, dh) / jnp.sqrt(jnp.float32(dh))
  kh = k.reshape(b, l, num_heads, dh)
  vh = v.reshape(b, l, num_heads, dh)
  logits = jnp.einsum("slhd,tlhd->lhst", qh, kh, precision=hi)     # (L, nh, seq, seq)
  pr = jax.nn.softmax(logits, axis=-1)
  ctx = jnp.einsum("lhst,tlhd->slhd", pr, vh, precision=hi).reshape(b, l, e)
  attn_out = jnp.einsum("sle,fe->slf", ctx, params["out_proj_w"], precision=hi)
  attn_out = attn_out + params["out_proj_b"]

  y = attn_out * params["attn_scale"]                              # (B, L, E)
  y = y.transpose(0, 2, 1).reshape(b, e, hp, wp)

  # ConvTranspose2d(E -> C, kernel=P, stride=P): each input pixel paints one PxP output patch.
  up = jnp.einsum("beij,ecpq->bcipjq", y, params["w_up"], precision=hi).reshape(b, c, h, w)
  return up + params["b_up"].reshape(1, c, 1, 1)


if __name__ == "__main__":
  # Shapes consistent with the module: batch=2, in_channels=4, spatial=16, patch=4, embed=64, heads=8.
  N, C, H, W = 2, 4, 16, 16
  PATCH, EMBED, HEADS = 4, 64, 8

  key = jax.random.PRNGKey(0)
  ks = jax.random.split(key, 9)
  f32 = jnp.float32
  x = jax.random.normal(ks[0], (N, C, H, W), dtype=f32)

  params = {
      "w_embed": 0.1 * jax.random.normal(ks[1], (EMBED, C, PATCH, PATCH), dtype=f32),
      "b_embed": 0.1 * jax.random.normal(ks[2], (EMBED,), dtype=f32),
      "in_proj_w": 0.1 * jax.random.normal(ks[3], (3 * EMBED, EMBED), dtype=f32),
      "in_proj_b": 0.1 * jax.random.normal(ks[4], (3 * EMBED,), dtype=f32),
      "out_proj_w": 0.1 * jax.random.normal(ks[5], (EMBED, EMBED), dtype=f32),
      "out_proj_b": 0.1 * jax.random.normal(ks[6], (EMBED,), dtype=f32),
      "attn_scale": jnp.full((1, 1, 1), 1.3, dtype=f32),   # non-trivial value to exercise the fold
      "w_up": 0.1 * jax.random.normal(ks[7], (EMBED, C, PATCH, PATCH), dtype=f32),
      "b_up": 0.1 * jax.random.normal(ks[8], (C,), dtype=f32),
  }

  out = patchwise_self_attention_forward(x, params, patch_size=PATCH, num_heads=HEADS)
  out = jax.block_until_ready(out)

  ref = patchwise_self_attention_reference(x, params, patch_size=PATCH, num_heads=HEADS)
  assert out.shape == (N, C, H, W)
  max_err = float(jnp.max(jnp.abs(out - ref)))
  # Tolerance slightly looser than 1e-4: host-side weight folds reorder f32 rounding and the
  # softmax uses the approximate EUP reciprocal (per the perf review).
  assert jnp.allclose(out, ref, atol=2e-3, rtol=2e-3), f"mismatch vs reference: max|err|={max_err}"

  print("KERNEL_OK")
</pallas_src>

<mosaic_0001>
module attributes {stable_mosaic.version = 11 : i64} {
  func.func @kernel(%arg0: i32, %arg1: memref<16x128xf32, #tpu.memory_space<vmem>>, %arg2: memref<128x384xf32, #tpu.memory_space<vmem>>, %arg3: memref<1x384xf32, #tpu.memory_space<vmem>>, %arg4: memref<128x16xf32, #tpu.memory_space<vmem>>, %arg5: memref<16x128xf32, #tpu.memory_space<vmem>>, %arg6: memref<128x128xf32, #tpu.memory_space<vmem>>, %arg7: memref<1x128xf32, #tpu.memory_space<vmem>>, %arg8: memref<16x128xf32, #tpu.memory_space<vmem>>) attributes {dimension_semantics = [#tpu.dimension_semantics<parallel>], iteration_bounds = array<i64: 1>, scalar_prefetch = 0 : i64, scratch_operands = 0 : i64, tpu.core_type = #tpu.core_type<tc>, window_params = [{transform_indices = @transform_0, window_bounds = array<i64: 16, 128>}, {pipeline_mode = #tpu.pipeline_mode<synchronous>, transform_indices = @transform_1, window_bounds = array<i64: 128, 384>}, {pipeline_mode = #tpu.pipeline_mode<synchronous>, transform_indices = @transform_2, window_bounds = array<i64: 1, 384>}, {pipeline_mode = #tpu.pipeline_mode<synchronous>, transform_indices = @transform_3, window_bounds = array<i64: 128, 16>}, {pipeline_mode = #tpu.pipeline_mode<synchronous>, transform_indices = @transform_4, window_bounds = array<i64: 16, 128>}, {pipeline_mode = #tpu.pipeline_mode<synchronous>, transform_indices = @transform_5, window_bounds = array<i64: 128, 128>}, {pipeline_mode = #tpu.pipeline_mode<synchronous>, transform_indices = @transform_6, window_bounds = array<i64: 1, 128>}, {transform_indices = @transform_7, window_bounds = array<i64: 16, 128>}]} {
    %c0 = arith.constant 0 : index
    %c0_0 = arith.constant 0 : index
    %0 = vector.load %arg1[%c0, %c0_0] : memref<16x128xf32, #tpu.memory_space<vmem>>, vector<16x128xf32>
    %c0_1 = arith.constant 0 : index
    %c0_2 = arith.constant 0 : index
    %1 = vector.load %arg2[%c0_1, %c0_2] : memref<128x384xf32, #tpu.memory_space<vmem>>, vector<128x384xf32>
    %cst = arith.constant dense<0.000000e+00> : vector<16x384xf32>
    %2 = tpu.matmul %0, %1, %cst {dimension_numbers = #tpu.dot_dimension_numbers<[1], [0], [0], [1], [0, 0, 1, 1], [], []>} : vector<16x128xf32>, vector<128x384xf32>, vector<16x384xf32> -> vector<16x384xf32>
    %c0_3 = arith.constant 0 : index
    %c0_4 = arith.constant 0 : index
    %3 = vector.load %arg3[%c0_3, %c0_4] : memref<1x384xf32, #tpu.memory_space<vmem>>, vector<1x384xf32>
    %4 = vector.broadcast %3 : vector<1x384xf32> to vector<16x384xf32>
    %5 = arith.addf %2, %4 : vector<16x384xf32>
    %6 = vector.extract_strided_slice %5 {offsets = [0, 0], sizes = [16, 128], strides = [1, 1]} : vector<16x384xf32> to vector<16x128xf32>
    %7 = vector.extract_strided_slice %5 {offsets = [0, 128], sizes = [16, 128], strides = [1, 1]} : vector<16x384xf32> to vector<16x128xf32>
    %8 = vector.extract_strided_slice %5 {offsets = [0, 256], sizes = [16, 128], strides = [1, 1]} : vector<16x384xf32> to vector<16x128xf32>
    %c0_5 = arith.constant 0 : index
    %c0_6 = arith.constant 0 : index
    %9 = vector.load %arg4[%c0_5, %c0_6] : memref<128x16xf32, #tpu.memory_space<vmem>>, vector<128x16xf32>
    %c0_7 = arith.constant 0 : index
    %c0_8 = arith.constant 0 : index
    %10 = vector.load %arg5[%c0_7, %c0_8] : memref<16x128xf32, #tpu.memory_space<vmem>>, vector<16x128xf32>
    %11 = arith.mulf %6, %7 : vector<16x128xf32>
    %cst_9 = arith.constant dense<0.000000e+00> : vector<16x16xf32>
    %12 = tpu.matmul %11, %9, %cst_9 {dimension_numbers = #tpu.dot_dimension_numbers<[1], [0], [0], [1], [0, 0, 1, 1], [], []>} : vector<16x128xf32>, vector<128x16xf32>, vector<16x16xf32> -> vector<16x16xf32>
    %13 = vector.extract_strided_slice %7 {offsets = [0, 64], sizes = [16, 64], strides = [1, 1]} : vector<16x128xf32> to vector<16x64xf32>
    %14 = vector.extract_strided_slice %7 {offsets = [0, 0], sizes = [16, 64], strides = [1, 1]} : vector<16x128xf32> to vector<16x64xf32>
    %15 = tpu.concatenate %13, %14 in 1 : vector<16x64xf32>, vector<16x64xf32> -> vector<16x128xf32>
    %16 = arith.mulf %6, %15 : vector<16x128xf32>
    %cst_10 = arith.constant dense<0.000000e+00> : vector<16x16xf32>
    %17 = tpu.matmul %16, %9, %cst_10 {dimension_numbers = #tpu.dot_dimension_numbers<[1], [0], [0], [1], [0, 0, 1, 1], [], []>} : vector<16x128xf32>, vector<128x16xf32>, vector<16x16xf32> -> vector<16x16xf32>
    %18 = arith.maximumf %12, %17 : vector<16x16xf32>
    %19 = arith.subf %12, %18 : vector<16x16xf32>
    %20 = math.exp %19 : vector<16x16xf32>
    %21 = arith.subf %17, %18 : vector<16x16xf32>
    %22 = math.exp %21 : vector<16x16xf32>
    %23 = arith.addf %20, %22 : vector<16x16xf32>
    %24 = tpu.reciprocal %23 {approx = true} : vector<16x16xf32> -> vector<16x16xf32>
    %25 = arith.mulf %20, %24 : vector<16x16xf32>
    %cst_11 = arith.constant dense<0.000000e+00> : vector<16x128xf32>
    %26 = tpu.matmul %25, %10, %cst_11 {dimension_numbers = #tpu.dot_dimension_numbers<[1], [0], [0], [1], [0, 0, 1, 1], [], []>} : vector<16x16xf32>, vector<16x128xf32>, vector<16x128xf32> -> vector<16x128xf32>
    %27 = arith.mulf %26, %8 : vector<16x128xf32>
    %28 = arith.mulf %22, %24 : vector<16x16xf32>
    %cst_12 = arith.constant dense<0.000000e+00> : vector<16x128xf32>
    %29 = tpu.matmul %28, %10, %cst_12 {dimension_numbers = #tpu.dot_dimension_numbers<[1], [0], [0], [1], [0, 0, 1, 1], [], []>} : vector<16x16xf32>, vector<16x128xf32>, vector<16x128xf32> -> vector<16x128xf32>
    %30 = vector.extract_strided_slice %8 {offsets = [0, 64], sizes = [16, 64], strides = [1, 1]} : vector<16x128xf32> to vector<16x64xf32>
    %31 = vector.extract_strided_slice %8 {offsets = [0, 0], sizes = [16, 64], strides = [1, 1]} : vector<16x128xf32> to vector<16x64xf32>
    %32 = tpu.concatenate %30, %31 in 1 : vector<16x64xf32>, vector<16x64xf32> -> vector<16x128xf32>
    %33 = arith.mulf %29, %32 : vector<16x128xf32>
    %34 = arith.addf %27, %33 : vector<16x128xf32>
    %c0_13 = arith.constant 0 : index
    %c0_14 = arith.constant 0 : index
    %35 = vector.load %arg6[%c0_13, %c0_14] : memref<128x128xf32, #tpu.memory_space<vmem>>, vector<128x128xf32>
    %cst_15 = arith.constant dense<0.000000e+00> : vector<16x128xf32>
    %36 = tpu.matmul %34, %35, %cst_15 {dimension_numbers = #tpu.dot_dimension_numbers<[1], [0], [0], [1], [0, 0, 1, 1], [], []>} : vector<16x128xf32>, vector<128x128xf32>, vector<16x128xf32> -> vector<16x128xf32>
    %c0_16 = arith.constant 0 : index
    %c0_17 = arith.constant 0 : index
    %37 = vector.load %arg7[%c0_16, %c0_17] : memref<1x128xf32, #tpu.memory_space<vmem>>, vector<1x128xf32>
    %38 = vector.broadcast %37 : vector<1x128xf32> to vector<16x128xf32>
    %39 = arith.addf %36, %38 : vector<16x128xf32>
    %c0_18 = arith.constant 0 : index
    %c0_19 = arith.constant 0 : index
    %40 = vector.load %arg8[%c0_18, %c0_19] : memref<16x128xf32, #tpu.memory_space<vmem>>, vector<16x128xf32>
    tpu.vector_store %arg8[%c0_18, %c0_19], %39 {strides = array<i32>} : memref<16x128xf32, #tpu.memory_space<vmem>>, vector<16x128xf32>,
    return
  }
  func.func @transform_0(%arg0: i32) -> (i32, i32) {
    %c0_i32 = arith.constant 0 : i32
    %c0_i32_0 = arith.constant 0 : i32
    return %arg0, %c0_i32 : i32, i32
  }
  func.func @transform_1(%arg0: i32) -> (i32, i32) {
    %c0_i32 = arith.constant 0 : i32
    %c0_i32_0 = arith.constant 0 : i32
    %c0_i32_1 = arith.constant 0 : i32
    return %c0_i32, %c0_i32_0 : i32, i32
  }
  func.func @transform_2(%arg0: i32) -> (i32, i32) {
    %c0_i32 = arith.constant 0 : i32
    %c0_i32_0 = arith.constant 0 : i32
    %c0_i32_1 = arith.constant 0 : i32
    return %c0_i32, %c0_i32_0 : i32, i32
  }
  func.func @transform_3(%arg0: i32) -> (i32, i32) {
    %c0_i32 = arith.constant 0 : i32
    %c0_i32_0 = arith.constant 0 : i32
    %c0_i32_1 = arith.constant 0 : i32
    return %c0_i32, %c0_i32_0 : i32, i32
  }
  func.func @transform_4(%arg0: i32) -> (i32, i32) {
    %c0_i32 = arith.constant 0 : i32
    %c0_i32_0 = arith.constant 0 : i32
    %c0_i32_1 = arith.constant 0 : i32
    return %c0_i32, %c0_i32_0 : i32, i32
  }
  func.func @transform_5(%arg0: i32) -> (i32, i32) {
    %c0_i32 = arith.constant 0 : i32
    %c0_i32_0 = arith.constant 0 : i32
    %c0_i32_1 = arith.constant 0 : i32
    return %c0_i32, %c0_i32_0 : i32, i32
  }
  func.func @transform_6(%arg0: i32) -> (i32, i32) {
    %c0_i32 = arith.constant 0 : i32
    %c0_i32_0 = arith.constant 0 : i32
    %c0_i32_1 = arith.constant 0 : i32
    return %c0_i32, %c0_i32_0 : i32, i32
  }
  func.func @transform_7(%arg0: i32) -> (i32, i32) {
    %c0_i32 = arith.constant 0 : i32
    %c0_i32_0 = arith.constant 0 : i32
    return %arg0, %c0_i32 : i32, i32
  }
}

</mosaic_0001>

<bundles_post_ra>
// kernel: tpu_custom_call.1
= control target key start
LH: loop header
LB: loop body
LE: loop exit
PB: predicated region body
PF: predicated region fallthrough
CT: control target
= control target key end

     0   :  { %12 = vsyncpa [#allocation3], 0  ;;  %s1521_s0 = inlined_call_operand.vmem [shape: f32[16,128], index: 0, kind: input, shape index: {}]   ;;  %s1522_s1 = inlined_call_operand.hbm [shape: f32[128,384], index: 1, kind: input, shape index: {}]   ;;  %s1523_s2 = inlined_call_operand.hbm [shape: f32[1,384], index: 2, kind: input, shape index: {}]   ;;  %s1524_s3 = inlined_call_operand.vmem [shape: f32[128,16], index: 3, kind: input, shape index: {}]   ;;  %s1525_s4 = inlined_call_operand.vmem [shape: f32[16,128], index: 4, kind: input, shape index: {}]   ;;  %s1526_s5 = inlined_call_operand.vmem [shape: f32[128,128], index: 5, kind: input, shape index: {}]   ;;  %s1527_s6 = inlined_call_operand.vmem [shape: f32[1,128], index: 6, kind: input, shape index: {}]   ;;  %s1528_s7 = inlined_call_operand.hbm [shape: f32[16,128], index: 7, kind: output, shape index: {}]  }
   0x1   :  { %13 = vsyncpa [#allocation6], 0 }
   0x2   :  { %14 = vsyncpa [#allocation4], 0  ;;  %s1269_s24 = smov [#allocation2]   ;;  %s1197_s28 = scalar_lea.hbm %s1522_s1, 6144 }
   0x3   :  { %s22_s25 = sshll.u32 %s1269_s24, 4  ;;  %p1198_p0 = scmp.ne.s32.totalorder %s1522_s1, %s1197_s28  ;;  %s23_s25 = int_to_ptr.vmem [resolvable:$true] %s22_s25 }
   0x4   :  { %p1201_p1 = scmp.lt.u32.totalorder %s1197_s28, %s1522_s1 }
   0x6   :  { %p1203_p2 = pnand %p1201_p1, %p1198_p0 }
   0x8   :  { %1206 = shalt.err (!%p1203_p2)
}
   0x9   :  { %s1207_s10 = scalar_lea.vmem %s23_s25, 6144  ;;  %p1212_p4 = scmp.lt.s32.totalorder %s23_s25, %s23_s25 }
   0xa   :  { %p1208_p3 = scmp.ne.s32.totalorder %s23_s25, %s1207_s10  ;;  %p1213_p5 = scmp.lt.s32.totalorder %s1207_s10, %s1207_s10 }
   0xc   :  { %p1214_p6 = por %p1213_p5, %p1212_p4 }
   0xe   :  { %p1215_p7 = pnand %p1214_p6, %p1208_p3 }
  0x10   :  { %1218 = shalt.err (!%p1215_p7)
}
  0x11   :  { %s1270_s11 = smov 384   ;;  %s1271_s12 = smov 24  }
  0x12   :  { %28 = dma.hbm_to_vmem [thread:$0]  %s1522_s1, 6144, %s23_s25, [#allocation3], %s1270_s11, %s1270_s11, %s1271_s12  }
  0x13   :  { %s1272_s15 = smov [#allocation5]   ;;  %s1219_s19 = scalar_lea.hbm %s1523_s2, 48 }
  0x14   :  { %s35_s16 = sshll.u32 %s1272_s15, 4  ;;  %p1220_p8 = scmp.ne.s32.totalorder %s1523_s2, %s1219_s19  ;;  %s36_s16 = int_to_ptr.vmem [resolvable:$true] %s35_s16 }
  0x15   :  { %p1223_p9 = scmp.lt.u32.totalorder %s1219_s19, %s1523_s2 }
  0x17   :  { %p1225_p10 = pnand %p1223_p9, %p1220_p8 }
  0x19   :  { %1228 = shalt.err (!%p1225_p10)
}
  0x1a   :  { %s1229_s24 = scalar_lea.vmem %s36_s16, 48  ;;  %s1233_s1 = scalar_lea.vmem %s36_s16, 64 }
  0x1b   :  { %p1230_p11 = scmp.ne.s32.totalorder %s36_s16, %s1229_s24  ;;  %p1234_p12 = scmp.lt.s32.totalorder %s36_s16, %s36_s16 }
  0x1c   :  { %p1235_p13 = scmp.lt.s32.totalorder %s1233_s1, %s1229_s24 }
  0x1e   :  { %p1236_p0 = por %p1235_p13, %p1234_p12 }
  0x20   :  { %p1237_p1 = pnand %p1236_p0, %p1230_p11 }
  0x22   :  { %1240 = shalt.err (!%p1237_p1)
}
  0x23   :  { %38 = dma.hbm_to_vmem [thread:$0]  %s1523_s2, 48, %s36_s16, [#allocation6]  }
  0x24   :  { %1263 = dma.done.wait [#allocation3], 6144  }
  0x25   :  { %1264 = vsyncadd [#allocation3], 4294961152 }
  0x26   :  { %1265 = dma.done.wait [#allocation6], 48  }
  0x27   :  { %1266 = vsyncadd [#allocation6], 4294967248  ;;  %v1273_v0 = vmov 0.0   ;;  %v56_v1 = vld [vmem:[#allocation2 + $0x8] sm:$0xff]  ;;  %v59_v2 = vld [vmem:[#allocation2 + $0x20] sm:$0xff]  ;;  %vm472_vm0 = vcmask 130048  }
  0x28   :  { %184 = vmatprep.mubr.f32.mxu0 %v1273_v0  ;;  %v55_v3 = vld [vmem:[#allocation2] sm:$0xff]  ;;  %v1008_v4 = vpack.c.bf16 %v59_v2, %v56_v1  ;;  %v58_v5 = vld [vmem:[#allocation2 + $0x18] sm:$0xff]  ;;  %v65_v7 = vld [vmem:[#allocation2 + $0x50] sm:$0xff]  ;;  %s1275_s22 = smov [#allocation7]  }
  0x29   :  { %v62_v6 = vld [vmem:[#allocation2 + $0x38] sm:$0xff]  ;;  %v1010_v8 = vpack.c.bf16 %v58_v5, %v55_v3  ;;  %v61_v10 = vld [vmem:[#allocation2 + $0x30] sm:$0xff]  ;;  %v64_v11 = vld [vmem:[#allocation2 + $0x48] sm:$0xff] }
  0x2a   :  { %v1012_v9 = vpack.c.bf16 %v65_v7, %v62_v6  ;;  %v68_v12 = vld [vmem:[#allocation2 + $0x68] sm:$0xff]  ;;  %1009 = vmatprep.subr.bf16.mxu0 %v1008_v4  ;;  %v71_v13 = vld [vmem:[#allocation2 + $0x80] sm:$0xff]  ;;  %v1014_v14 = vpack.c.bf16 %v64_v11, %v61_v10  ;;  %v70_v17 = vld [vmem:[#allocation2 + $0x78] sm:$0xff] }
  0x2b   :  { %1011 = vmatpush1.bf16.msra.mxu0 %v1010_v8  ;;  %v1016_v15 = vpack.c.bf16 %v71_v13, %v68_v12  ;;  %v67_v16 = vld [vmem:[#allocation2 + $0x60] sm:$0xff]  ;;  %v74_v18 = vld [vmem:[#allocation2 + $0x98] sm:$0xff]  ;;  %v77_v19 = vld [vmem:[#allocation2 + $0xb0] sm:$0xff] }
  0x2c   :  { %1013 = vmatprep.subr.bf16.mxu0 %v1012_v9  ;;  %v1018_v20 = vpack.c.bf16 %v70_v17, %v67_v16  ;;  %v1020_v21 = vpack.c.bf16 %v77_v19, %v74_v18  ;;  %v73_v22 = vld [vmem:[#allocation2 + $0x90] sm:$0xff]  ;;  %v76_v23 = vld [vmem:[#allocation2 + $0xa8] sm:$0xff]  ;;  %v83_v25 = vld [vmem:[#allocation2 + $0xe0] sm:$0xff] }
  0x2d   :  { %v80_v24 = vld [vmem:[#allocation2 + $0xc8] sm:$0xff]  ;;  %v53_v26 = vld [vmem:[%s1521_s0] sm:$0xff]  ;;  %v1022_v27 = vpack.c.bf16 %v76_v23, %v73_v22  ;;  %v82_v30 = vld [vmem:[#allocation2 + $0xd8] sm:$0xff] }
  0x2e   :  { %886 = vmatprep.mubr.f32.mxu1 %v53_v26  ;;  %v1024_v28 = vpack.c.bf16 %v83_v25, %v80_v24  ;;  %v79_v29 = vld [vmem:[#allocation2 + $0xc0] sm:$0xff]  ;;  %v86_v31 = vld [vmem:[#allocation2 + $0xf8] sm:$0xff]  ;;  %v89_v32 = vld [vmem:[#allocation2 + $0x110] sm:$0xff] }
  0x2f   :  { %1015 = vmatpush1.bf16.msra.mxu0 %v1014_v14  ;;  %v1026_v33 = vpack.c.bf16 %v82_v30, %v79_v29  ;;  %v1028_v34 = vpack.c.bf16 %v89_v32, %v86_v31  ;;  %v85_v35 = vld [vmem:[#allocation2 + $0xf0] sm:$0xff]  ;;  %v88_v36 = vld [vmem:[#allocation2 + $0x108] sm:$0xff]  ;;  %v95_v38 = vld [vmem:[#allocation2 + $0x140] sm:$0xff] }
  0x30   :  { %1017 = vmatprep.subr.bf16.mxu0 %v1016_v15  ;;  %v92_v37 = vld [vmem:[#allocation2 + $0x128] sm:$0xff]  ;;  %v1030_v39 = vpack.c.bf16 %v88_v36, %v85_v35  ;;  %v91_v41 = vld [vmem:[#allocation2 + $0x120] sm:$0xff]  ;;  %v94_v42 = vld [vmem:[#allocation2 + $0x138] sm:$0xff]  ;;  %v105_v35 = vlaneseq }
  0x31   :  { %v1032_v40 = vpack.c.bf16 %v95_v38, %v92_v37  ;;  %v98_v43 = vld [vmem:[#allocation2 + $0x158] sm:$0xff]  ;;  %v101_v44 = vld [vmem:[#allocation2 + $0x170] sm:$0xff]  ;;  %v1034_v45 = vpack.c.bf16 %v94_v42, %v91_v41  ;;  %v100_v48 = vld [vmem:[#allocation2 + $0x168] sm:$0xff] }
  0x32   :  { %v1036_v46 = vpack.c.bf16 %v101_v44, %v98_v43  ;;  %v97_v47 = vld [vmem:[#allocation2 + $0x150] sm:$0xff]  ;;  %v272_v49 = vld [vmem:[%s1524_s3] sm:$0xff]  ;;  %v273_v50 = vld [vmem:[%s1524_s3 + $0x8] sm:$0xff]  ;;  %v106_v36 = vshrl.u32 %v105_v35, 7 }
  0x33   :  { %1019 = vmatpush1.bf16.msra.mxu0 %v1018_v20  ;;  %v1038_v51 = vpack.c.bf16 %v100_v48, %v97_v47  ;;  %v1352_v52 = vpack.c.bf16 %v273_v50, %v272_v49  ;;  %v274_v53 = vld [vmem:[%s1524_s3 + $0x10] sm:$0xff]  ;;  %v275_v54 = vld [vmem:[%s1524_s3 + $0x18] sm:$0xff]  ;;  %v276_v56 = vld [vmem:[%s1524_s3 + $0x20] sm:$0xff] }
  0x34   :  { %1021 = vmatprep.subr.bf16.mxu0 %v1020_v21  ;;  %v1361_v55 = vpack.c.bf16 %v275_v54, %v274_v53  ;;  %v277_v57 = vld [vmem:[%s1524_s3 + $0x28] sm:$0xff]  ;;  %v278_v60 = vld [vmem:[%s1524_s3 + $0x30] sm:$0xff]  ;;  %v279_v61 = vld [vmem:[%s1524_s3 + $0x38] sm:$0xff]  ;;  %v107_v37 = vsub.s32 0, %v106_v36 }
  0x35   :  { %v1373_v58 = vld [vmem:[%s1521_s0 + $0x8] sm:$0xff]  ;;  %v1377_v59 = vpack.c.bf16 %v277_v57, %v276_v56  ;;  %v1388_v62 = vpack.c.bf16 %v279_v61, %v278_v60  ;;  %v280_v63 = vld [vmem:[%s1524_s3 + $0x40] sm:$0xff]  ;;  %v282_v2 = vld [vmem:[%s1524_s3 + $0x50] sm:$0xff] }
  0x36   :  { %v283_v3 = vld [vmem:[%s1524_s3 + $0x58] sm:$0xff]  ;;  %v284_v5 = vld [vmem:[%s1524_s3 + $0x60] sm:$0xff]  ;;  %v285_v6 = vld [vmem:[%s1524_s3 + $0x68] sm:$0xff] }
  0x37   :  { %1023 = vmatpush1.bf16.msra.mxu0 %v1022_v27  ;;  %v1408_v4 = vpack.c.bf16 %v283_v3, %v282_v2  ;;  %v1096_v7 = vpack.c.bf16 %v285_v6, %v284_v5  ;;  %v286_v8 = vld [vmem:[%s1524_s3 + $0x70] sm:$0xff]  ;;  %v287_v9 = vld [vmem:[%s1524_s3 + $0x78] sm:$0xff]  ;;  %v60_v12 = vld [vmem:[#allocation2 + $0x28] sm:$0xff] }
  0x38   :  { %1025 = vmatprep.subr.bf16.mxu0 %v1024_v28  ;;  %v1100_v10 = vpack.c.bf16 %v287_v9, %v286_v8  ;;  %v57_v11 = vld [vmem:[#allocation2 + $0x10] sm:$0xff]  ;;  %v63_v13 = vld [vmem:[#allocation2 + $0x40] sm:$0xff]  ;;  %v66_v15 = vld [vmem:[#allocation2 + $0x58] sm:$0xff] }
  0x39   :  { %v1040_v14 = vpack.c.bf16 %v60_v12, %v57_v11  ;;  %v1044_v16 = vpack.c.bf16 %v66_v15, %v63_v13  ;;  %v69_v17 = vld [vmem:[#allocation2 + $0x70] sm:$0xff]  ;;  %v72_v18 = vld [vmem:[#allocation2 + $0x88] sm:$0xff]  ;;  %v75_v20 = vld [vmem:[#allocation2 + $0xa0] sm:$0xff] }
  0x3a   :  { %v1048_v19 = vpack.c.bf16 %v72_v18, %v69_v17  ;;  %v78_v21 = vld [vmem:[#allocation2 + $0xb8] sm:$0xff]  ;;  %v81_v23 = vld [vmem:[#allocation2 + $0xd0] sm:$0xff]  ;;  %v84_v24 = vld [vmem:[#allocation2 + $0xe8] sm:$0xff] }
  0x3b   :  { %1027 = vmatpush1.bf16.msra.mxu0 %v1026_v33  ;;  %1041 = vmatprep.subr.bf16.mxu1 %v1040_v14  ;;  %v1052_v22 = vpack.c.bf16 %v78_v21, %v75_v20  ;;  %v1056_v25 = vpack.c.bf16 %v84_v24, %v81_v23  ;;  %v90_v27 = vld [vmem:[#allocation2 + $0x118] sm:$0xff]  ;;  %v93_v29 = vld [vmem:[#allocation2 + $0x130] sm:$0xff]  ;;  %v96_v30 = vld [vmem:[#allocation2 + $0x148] sm:$0xff] }
  0x3c   :  { %1029 = vmatprep.subr.bf16.mxu0 %v1028_v34  ;;  %1043 = vmatpush3.bf16.msra.mxu1 %v1040_v14  ;;  %v1064_v31 = vpack.c.bf16 %v96_v30, %v93_v29  ;;  %v99_v32 = vld [vmem:[#allocation2 + $0x160] sm:$0xff]  ;;  %v102_v33 = vld [vmem:[#allocation2 + $0x178] sm:$0xff]  ;;  %v653_v5 = vld [vmem:[%s1526_s5 + $0x10] sm:$0xff] }
  0x3d   :  { %1045 = vmatprep.subr.bf16.mxu1 %v1044_v16  ;;  %v1068_v34 = vpack.c.bf16 %v102_v33, %v99_v32  ;;  %v103_v38 = vld [vmem:[#allocation5] sm:$0x7]  ;;  %v657_v12 = vld [vmem:[%s1526_s5 + $0x30] sm:$0xff]  ;;  %v658_v13 = vld [vmem:[%s1526_s5 + $0x38] sm:$0xff] }
  0x3e   :  { %v651_v3 = vld [vmem:[%s1526_s5] sm:$0xff]  ;;  %v1156_v14 = vpack.c.bf16 %v658_v13, %v657_v12  ;;  %v661_v18 = vld [vmem:[%s1526_s5 + $0x50] sm:$0xff] }
  0x3f   :  { %1031 = vmatpush1.bf16.msra.mxu0 %v1030_v39  ;;  %v111_v39 = vsub.s32 1, %v106_v36  ;;  %v655_v9 = vld [vmem:[%s1526_s5 + $0x20] sm:$0xff] }
  0x40   :  { %1033 = vmatprep.subr.bf16.mxu0 %v1032_v40  ;;  %1047 = vmatpush3.bf16.msra.mxu1 %v1044_v16  ;;  %v108_v40 = vrot.slane %v103_v38, %v107_v37  ;;  %v659_v15 = vld [vmem:[%s1526_s5 + $0x40] sm:$0xff]  ;;  %v660_v16 = vld [vmem:[%s1526_s5 + $0x48] sm:$0xff] }
  0x41   :  { %1049 = vmatprep.subr.bf16.mxu1 %v1048_v19  ;;  %v112_v41 = vrot.slane %v103_v38, %v111_v39  ;;  %v1160_v17 = vpack.c.bf16 %v660_v16, %v659_v15 }
  0x43   :  { %1035 = vmatpush1.bf16.msra.mxu0 %v1034_v45 }
  0x44   :  { %1037 = vmatprep.subr.bf16.mxu0 %v1036_v46  ;;  %1051 = vmatpush3.bf16.msra.mxu1 %v1048_v19  ;;  %v662_v19 = vld [vmem:[%s1526_s5 + $0x58] sm:$0xff] }
  0x45   :  { %1053 = vmatprep.subr.bf16.mxu1 %v1052_v22  ;;  %v1164_v20 = vpack.c.bf16 %v662_v19, %v661_v18 }
  0x47   :  { %1039 = vmatpush1.bf16.msra.mxu0 %v1038_v51 }
  0x48   :  { %1073 = vmatprep.subr.bf16.mxu0 %v1352_v52  ;;  %1055 = vmatpush3.bf16.msra.mxu1 %v1052_v22 }
  0x49   :  { %1057 = vmatprep.subr.bf16.mxu1 %v1056_v25 }
  0x4a   :  { %185 = vmatmul.mubr.f32.vlgmr.msra.gmra.mrb[0].mxu0 %v53_v26  ;;  %v87_v26 = vld [vmem:[#allocation2 + $0x100] sm:$0xff] }
  0x4b   :  { %190 = vmatprep.mubr.f32.mxu0 %v1273_v0  ;;  %1075 = vmatpush3.bf16.msra.mxu0 %v1352_v52  ;;  %v281_v0 = vld [vmem:[%s1524_s3 + $0x48] sm:$0xff]  ;;  %v1060_v28 = vpack.c.bf16 %v90_v27, %v87_v26  ;;  %s1274_s3 = smov 64  }
  0x4c   :  { %1077 = vmatprep.subr.bf16.mxu0 %v1361_v55  ;;  %v1398_v1 = vpack.c.bf16 %v281_v0, %v280_v63  ;;  %1059 = vmatpush3.bf16.msra.mxu1 %v1056_v25  ;;  %v288_v0 = vld [vmem:[%s1525_s4] sm:$0xff] }
  0x4d   :  { %1061 = vmatprep.subr.bf16.mxu1 %v1060_v28 }
  0x4e   :  { %191 = vmatmul.mubr.f32.gmra.mrb[2].mxu0 %v1373_v58 }
  0x4f   :  { %1079 = vmatpush3.bf16.msra.mxu0 %v1361_v55 }
  0x50   :  { %1081 = vmatprep.subr.bf16.mxu0 %v1377_v59  ;;  %1063 = vmatpush3.bf16.msra.mxu1 %v1060_v28 }
  0x51   :  { %1065 = vmatprep.subr.bf16.mxu1 %v1064_v31 }
  0x53   :  { %1083 = vmatpush3.bf16.msra.mxu0 %v1377_v59 }
  0x54   :  { %1085 = vmatprep.subr.bf16.mxu0 %v1388_v62  ;;  %1067 = vmatpush3.bf16.msra.mxu1 %v1064_v31 }
  0x55   :  { %1069 = vmatprep.subr.bf16.mxu1 %v1068_v34 }
  0x57   :  { %1087 = vmatpush3.bf16.msra.mxu0 %v1388_v62 }
  0x58   :  { %1089 = vmatprep.subr.bf16.mxu0 %v1398_v1  ;;  %1071 = vmatpush3.bf16.msra.mxu1 %v1068_v34 }
  0x59   :  { %1105 = vmatprep.subr.bf16.mxu1 %v1352_v52 }
  0x5b   :  { %1091 = vmatpush3.bf16.msra.mxu0 %v1398_v1  ;;  %887 = vmatmul.mubr.f32.vlgmr.msra.gmra.mrb[0].mxu1 %v1373_v58 }
  0x5c   :  { %1093 = vmatprep.subr.bf16.mxu0 %v1408_v4  ;;  %1107 = vmatpush3.bf16.msra.mxu1 %v1352_v52 }
  0x5d   :  { %1109 = vmatprep.subr.bf16.mxu1 %v1361_v55 }
  0x5f   :  { %1095 = vmatpush3.bf16.msra.mxu0 %v1408_v4 }
  0x60   :  { %1097 = vmatprep.subr.bf16.mxu0 %v1096_v7  ;;  %1111 = vmatpush3.bf16.msra.mxu1 %v1361_v55  ;;  %v115_v55 = vsub.s32 2, %v106_v36 }
  0x61   :  { %1113 = vmatprep.subr.bf16.mxu1 %v1377_v59 }
  0x62   :  { %v116_v57 = vrot.slane %v103_v38, %v115_v55 }
  0x63   :  { %1099 = vmatpush3.bf16.msra.mxu0 %v1096_v7 }
  0x64   :  { %1101 = vmatprep.subr.bf16.mxu0 %v1100_v10  ;;  %1115 = vmatpush3.bf16.msra.mxu1 %v1377_v59 }
  0x65   :  { %1117 = vmatprep.subr.bf16.mxu1 %v1388_v62 }
  0x67   :  { %1103 = vmatpush3.bf16.msra.mxu0 %v1100_v10 }
  0x68   :  { %1119 = vmatpush3.bf16.msra.mxu1 %v1388_v62 }
  0x69   :  { %1121 = vmatprep.subr.bf16.mxu1 %v1398_v1 }
  0x6c   :  { %1123 = vmatpush3.bf16.msra.mxu1 %v1398_v1  ;;  %v289_v1 = vld [vmem:[%s1525_s4 + $0x8] sm:$0xff]  ;;  %s756_s4 = sshll.u32 %s1275_s22, 4  ;;  %s757_s4 = int_to_ptr.vmem [resolvable:$true] %s756_s4 }
  0x6d   :  { %1125 = vmatprep.subr.bf16.mxu1 %v1408_v4  ;;  %v1450_v2 = vpack.c.bf16 %v289_v1, %v288_v0  ;;  %v773_v1 = vld [vmem:[%s1527_s6] ss:$0 sm:$0xff]  ;;  %s1241_s0 = scalar_lea.vmem %s757_s4, 256  ;;  %p1246_p3 = scmp.lt.s32.totalorder %s757_s4, %s757_s4 }
  0x6e   :  { %p1242_p2 = scmp.ne.s32.totalorder %s757_s4, %s1241_s0  ;;  %p1247_p4 = scmp.lt.s32.totalorder %s1241_s0, %s1241_s0 }
  0x70   :  { %1127 = vmatpush3.bf16.msra.mxu1 %v1408_v4  ;;  %v652_v4 = vld [vmem:[%s1526_s5 + $0x8] sm:$0xff]  ;;  %p1248_p5 = por %p1247_p4, %p1246_p3 }
  0x71   :  { %1129 = vmatprep.subr.bf16.mxu1 %v1096_v7  ;;  %v1144_v6 = vpack.c.bf16 %v652_v4, %v651_v3 }
  0x72   :  { %p1249_p6 = pnand %p1248_p5, %p1242_p2 }
  0x73   :  { %1145 = vmatprep.subr.bf16.mxu0 %v1144_v6 }
  0x74   :  { %1131 = vmatpush3.bf16.msra.mxu1 %v1096_v7  ;;  %v654_v7 = vld [vmem:[%s1526_s5 + $0x18] sm:$0xff] }
  0x75   :  { %1133 = vmatprep.subr.bf16.mxu1 %v1100_v10  ;;  %v1148_v8 = vpack.c.bf16 %v654_v7, %v653_v5 }
  0x78   :  { %1135 = vmatpush3.bf16.msra.mxu1 %v1100_v10  ;;  %v656_v10 = vld [vmem:[%s1526_s5 + $0x28] sm:$0xff] }
  0x79   :  { %1137 = vmatprep.subr.bf16.mxu1 %v1450_v2  ;;  %v1152_v11 = vpack.c.bf16 %v656_v10, %v655_v9 }
 0x11d   :  { %v186_v42 = vpop.f32.mrb[0].mxu0 }
 0x11e   :  { %v187_v43 = vadd.f32 %v186_v42, %v108_v40  ;;  %v188_v44 = vpop.f32.mrb[1].mxu0 }
 0x11f   :  { %v189_v45 = vadd.f32 %v188_v44, %v112_v41 }
 0x121   :  { %v290_v46 = vmul.f32 %v189_v45, %v187_v43  ;;  %v192_v47 = vpop.f32.mrb[2].mxu0  ;;  %369 = vrot.lane.b32.xlu0 %v189_v45, %s1274_s3  ;;  %v663_v45 = vld [vmem:[%s1526_s5 + $0x60] sm:$0xff] }
 0x122   :  { %v193_v48 = vadd.f32 %v192_v47, %v108_v40  ;;  %v194_v49 = vpop.f32.mrb[3].mxu0 }
 0x123   :  { %v195_v50 = vadd.f32 %v194_v49, %v112_v41  ;;  %921 = vmatprep.mubr.f32.mxu0 %v290_v46  ;;  %v664_v46 = vld [vmem:[%s1526_s5 + $0x68] sm:$0xff]  ;;  %v666_v49 = vld [vmem:[%s1526_s5 + $0x78] sm:$0xff] }
 0x124   :  { %v1168_v47 = vpack.c.bf16 %v664_v46, %v663_v45 }
 0x125   :  { %v291_v51 = vmul.f32 %v195_v50, %v193_v48  ;;  %371 = vrot.lane.b32.xlu0 %v195_v50, %s1274_s3 }
 0x127   :  { %922 = vmatmul.mubr.f32.vlgmr.msra.gmra.mrb[4].mxu0 %v291_v51 }
 0x128   :  { %1147 = vmatpush3.bf16.msra.mxu0 %v1144_v6 }
 0x129   :  { %1149 = vmatprep.subr.bf16.mxu0 %v1148_v8 }
 0x12c   :  { %1151 = vmatpush3.bf16.msra.mxu0 %v1148_v8 }
 0x12d   :  { %1153 = vmatprep.subr.bf16.mxu0 %v1152_v11 }
 0x12e   :  { %v888_v58 = vpop.f32.mrb[0].mxu1 }
 0x12f   :  { %v263_v59 = vpop.f32.mrb[1].mxu1  ;;  %v1440_v61 = vadd.f32 %v888_v58, %v116_v57 }
 0x130   :  { %v1438_v60 = vadd.f32 %v263_v59, %v116_v57  ;;  %1155 = vmatpush3.bf16.msra.mxu0 %v1152_v11 }
 0x131   :  { %1157 = vmatprep.subr.bf16.mxu0 %v1156_v14 }
 0x132   :  { %641 = vrot.lane.b32.xlu1 %v1438_v60, %s1274_s3 }
 0x134   :  { %1159 = vmatpush3.bf16.msra.mxu0 %v1156_v14 }
 0x135   :  { %1161 = vmatprep.subr.bf16.mxu0 %v1160_v17 }
 0x136   :  { %643 = vrot.lane.b32.xlu1 %v1440_v61, %s1274_s3 }
 0x138   :  { %1163 = vmatpush3.bf16.msra.mxu0 %v1160_v17 }
 0x139   :  { %1165 = vmatprep.subr.bf16.mxu0 %v1164_v20 }
 0x13c   :  { %1167 = vmatpush3.bf16.msra.mxu0 %v1164_v20 }
 0x13d   :  { %1169 = vmatprep.subr.bf16.mxu0 %v1168_v47 }
 0x140   :  { %1171 = vmatpush3.bf16.msra.mxu0 %v1168_v47 }
 0x193   :  { %v370_v52 = vpop.permute.xlu0 %369 }
 0x194   :  { %v375_v53 = vmul.f32 %v370_v52, %v187_v43 }
 0x196   :  { %956 = vmatprep.mubr.f32.mxu1 %v375_v53 }
 0x197   :  { %v372_v54 = vpop.permute.xlu0 %371 }
 0x198   :  { %v376_v56 = vmul.f32 %v372_v54, %v193_v48  ;;  %v665_v48 = vld [vmem:[%s1526_s5 + $0x70] sm:$0xff] }
 0x199   :  { %v1172_v50 = vpack.c.bf16 %v666_v49, %v665_v48 }
 0x19a   :  { %957 = vmatmul.mubr.f32.vlgmr.msra.gmra.mrb[2].mxu1 %v376_v56 }
 0x19b   :  { %1139 = vmatpush3.bf16.msra.mxu1 %v1450_v2  ;;  %1173 = vmatprep.subr.bf16.mxu0 %v1172_v50 }
 0x19c   :  { %1141 = vmatprep.subr.bf16.mxu1 %v1450_v2  ;;  %1175 = vmatpush3.bf16.msra.mxu0 %v1172_v50 }
 0x1a4   :  { %v642_v51 = vpop.permute.xlu1 %641 }
 0x1a8   :  { %v644_v54 = vpop.permute.xlu1 %643 }
 0x1fa   :  { %v923_v62 = vpop.f32.mrb[4].mxu0 }
 0x1fb   :  { %v358_v63 = vpop.f32.mrb[5].mxu0 }
 0x26d   :  { %v958_v21 = vpop.f32.mrb[2].mxu1 }
 0x26e   :  { %v453_v22 = vmax.f32 %v923_v62, %v958_v21  ;;  %v443_v23 = vpop.f32.mrb[3].mxu1 }
 0x26f   :  { %v452_v24 = vmax.f32 %v358_v63, %v443_v23 }
 0x270   :  { %v455_v25 = vsub.f32 %v923_v62, %v453_v22  ;;  %v461_v26 = vsub.f32 %v958_v21, %v453_v22 }
 0x271   :  { %v454_v27 = vsub.f32 %v358_v63, %v452_v24  ;;  %v460_v28 = vsub.f32 %v443_v23, %v452_v24 }
 0x272   :  { %v458_v29 = vmul.f32 1.442695, %v455_v25  ;;  %v464_v30 = vmul.f32 1.442695, %v461_v26 }
 0x273   :  { %v456_v31 = vmul.f32 1.442695, %v454_v27  ;;  %v462_v32 = vmul.f32 1.442695, %v460_v28 }
 0x274   :  { %1185 = vpow2.f32 %v458_v29 }
 0x275   :  { %1187 = vpow2.f32 %v464_v30 }
 0x276   :  { %1189 = vpow2.f32 %v456_v31 }
 0x277   :  { %1191 = vpow2.f32 %v462_v32 }
 0x27e   :  { %v1186_v33 = vpop.eup %1185 }
 0x27f   :  { %v1188_v34 = vpop.eup %1187 }
 0x280   :  { %v1190_v35 = vpop.eup %1189  ;;  %v467_v36 = vadd.f32 %v1188_v34, %v1186_v33 }
 0x281   :  { %v1192_v37 = vpop.eup %1191 }
 0x282   :  { %1193 = vrcp.f32 %v467_v36  ;;  %v466_v38 = vadd.f32 %v1192_v37, %v1190_v35 }
 0x284   :  { %1195 = vrcp.f32 %v466_v38 }
 0x28c   :  { %v1194_v39 = vpop.eup %1193 }
 0x28d   :  { %v471_v40 = vmul.f32 %v1194_v39, %v1186_v33  ;;  %v557_v41 = vmul.f32 %v1194_v39, %v1188_v34 }
 0x28e   :  { %v1196_v42 = vpop.eup %1195 }
 0x28f   :  { %v470_v43 = vmul.f32 %v1196_v42, %v1190_v35  ;;  %v556_v44 = vmul.f32 %v1196_v42, %v1192_v37 }
 0x291   :  { %963 = vmatprep.mubr.msk.f32.mxu1 %vm472_vm0, %v470_v43 }
 0x292   :  { %964 = vmatmul.mubr.msk.f32.vlgmr.msra.gmra.mrb[4].mxu1 %vm472_vm0, %v471_v40 }
 0x293   :  { %1143 = vmatpush3.bf16.msra.mxu1 %v1450_v2  ;;  %970 = vmatprep.mubr.msk.f32.mxu1 %vm472_vm0, %v556_v44 }
 0x296   :  { %971 = vmatmul.mubr.msk.f32.vlgmr.msra.gmra.mrb[6].mxu1 %vm472_vm0, %v557_v41 }
 0x365   :  { %v965_v52 = vpop.f32.mrb[4].mxu1 }
 0x366   :  { %v545_v53 = vpop.f32.mrb[5].mxu1  ;;  %v555_v56 = vmul.f32 %v965_v52, %v1440_v61 }
 0x367   :  { %v554_v59 = vmul.f32 %v545_v53, %v1438_v60 }
 0x369   :  { %v972_v55 = vpop.f32.mrb[6].mxu1 }
 0x36a   :  { %v648_v57 = vmul.f32 %v972_v55, %v644_v54  ;;  %v630_v58 = vpop.f32.mrb[7].mxu1 }
 0x36b   :  { %v647_v62 = vmul.f32 %v642_v51, %v630_v58 }
 0x36c   :  { %v650_v63 = vadd.f32 %v648_v57, %v555_v56 }
 0x36d   :  { %v649_v0 = vadd.f32 %v647_v62, %v554_v59 }
 0x36f   :  { %1005 = vmatprep.mubr.f32.mxu0 %v649_v0 }
 0x370   :  { %1006 = vmatmul.mubr.f32.vlgmr.msra.gmra.mrb[6].mxu0 %v650_v63 }
 0x443   :  { %v1007_v2 = vpop.f32.mrb[6].mxu0 }
 0x444   :  { %v746_v3 = vadd.f32 %v1007_v2, %v773_v1  ;;  %v740_v4 = vpop.f32.mrb[7].mxu0 }
 0x445   :  { %v741_v61 = vadd.f32 %v773_v1, %v740_v4 }
 0x446   :  { %750 = vst [vmem:[#allocation7 + $0x8] sm:$0xff] %v746_v3 }
 0x447   :  { %749 = vst [vmem:[#allocation7] sm:$0xff] %v741_v61 }
 0x448   :  { %1252 = shalt.err (!%p1249_p6)
}
 0x449   :  { %s1253_s6 = scalar_lea.hbm %s1528_s7, 256 }
 0x44a   :  { %p1254_p7 = scmp.ne.s32.totalorder %s1528_s7, %s1253_s6  ;;  %p1257_p8 = scmp.lt.u32.totalorder %s1253_s6, %s1528_s7 }
 0x44c   :  { %p1259_p9 = pnand %p1257_p8, %p1254_p7 }
 0x44e   :  { %1262 = shalt.err (!%p1259_p9)
}
 0x44f   :  { %s1276_s27 = smov 128   ;;  %s1277_s28 = smov 8  }
 0x450   :  { %762 = dma.vmem_to_hbm [thread:$0]  %s757_s4, 256, %s1528_s7, [#allocation4], %s1276_s27, %s1276_s27, %s1277_s28  }
 0x451   :  { %1267 = dma.done.wait [#allocation4], 256  }
 0x452   :  { %1268 = vsyncadd [#allocation4], 4294967040 }
 0x453   :  { %766 = vsyncpa [#allocation3], 1 }
 0x454   :  { %767 = vsyncpa [#allocation6], 1 }
 0x455   :  { %768 = vsyncpa [#allocation4], 1 }

</bundles_post_ra>
